<compile_context>
chip_gen: v7x
topology: tpu7x:2x2x1
jax: 0.10.0
libtpu: 0.0.40
codegen_flags: <defaults>
</compile_context>

<pallas_src>
import jax
import jax.numpy as jnp
from jax.experimental import pallas as pl
from jax.experimental.pallas import tpu as pltpu

# ---------------- config (small, consistent with the module) ----------------
B = 2          # batch
F_FEAT = 8     # n_features
D = 32         # embedding_dim
N_VOCAB = 16   # n_vocab (embedding table has n_vocab + 1 rows)
N_LAYERS = 2   # aggregator.n_layers
LN_EPS = 1e-5  # F.layer_norm default
BF = B * F_FEAT

# ---- "data" slab layout (per-call tensors; lane width = D) ------------------
IDS_OFF = 0                      # rows [0, BF): masked token ids in lane 0
M_OFF = BF                       # rows [BF, BF+B): pre-scaled block-diag m rows
I_OFF = BF + B                   # rows [BF+B, BF+2B): block-diag I rows
DATA_ROWS = 24                   # padded to a sublane multiple

# ---- "param" slab layout (parameters; lane width = D) -----------------------
EMB_OFF = 0                      # rows [0, N_VOCAB+1): tied embedding table
POS_OFF = 24                     # rows [24, 24+F): positional embeddings
W_OFF = 32                       # per layer l: w1 rows [W_OFF+2*D*l, +D), w2 next D rows
V_OFF = W_OFF + 2 * D * N_LAYERS # 6 rows per layer: b1, b2, ga, ba, gf, bf
PAR_ROWS = 176


def _layer_norm(v, gamma, beta):
    # v: (R, D); gamma/beta: (1, D) -> normalized over last dim, like F.layer_norm.
    mu = jnp.mean(v, axis=-1, keepdims=True)
    var = jnp.mean((v - mu) ** 2, axis=-1, keepdims=True)
    return (v - mu) * jax.lax.rsqrt(var + LN_EPS) * gamma + beta


def ctx_agg_kernel(data_ref, par_ref, out_ref):
    data = data_ref[...]                                   # (DATA_ROWS, D) one load
    ids = data[IDS_OFF:IDS_OFF + BF, 0:1]                  # (BF, 1) token ids (exact small ints)
    m_rows = data[M_OFF:M_OFF + B, 0:BF]                   # (B, BF) pre-scaled block-diag (I+S)/sum
    i_rows = data[I_OFF:I_OFF + B, 0:BF]                   # (B, BF) block-diag I

    # ---- token_to_embeddings: one-hot gather on the MXU (exact) + positional ----
    tab = par_ref[EMB_OFF:EMB_OFF + N_VOCAB + 1, :]        # (V+1, D)
    pos = par_ref[POS_OFF:POS_OFF + F_FEAT, :]             # (F, D)
    lane_ids = jax.lax.broadcasted_iota(jnp.int32, (BF, N_VOCAB + 1), 1)
    onehot = (lane_ids == ids.astype(jnp.int32)).astype(jnp.float32)      # (BF, V+1)
    x = jnp.dot(onehot, tab, preferred_element_type=jnp.float32)          # (BF, D)
    x = x + jnp.concatenate([pos] * B, axis=0)                            # tile pos over batch

    for l in range(N_LAYERS):
        wbase = W_OFF + 2 * D * l
        w1 = par_ref[wbase:wbase + D, :]                   # (D, D)
        w2 = par_ref[wbase + D:wbase + 2 * D, :]           # (D, D)
        vbase = V_OFF + 6 * l
        b1 = par_ref[vbase + 0:vbase + 1, :]               # (1, D) each
        b2 = par_ref[vbase + 1:vbase + 2, :]
        ga = par_ref[vbase + 2:vbase + 3, :]
        ba = par_ref[vbase + 3:vbase + 4, :]
        gf = par_ref[vbase + 4:vbase + 5, :]
        bf = par_ref[vbase + 5:vbase + 6, :]

        # ---- aggregate: masked mean over features. Mask rows are pre-scaled and
        # block-diagonal, so one (B, B*F) @ (B*F, D) matmul yields the mean directly.
        agg = jnp.dot(m_rows, x, preferred_element_type=jnp.float32)      # (B, D)
        # LayerNorm the (B, D) aggregate BEFORE broadcasting (rows identical,
        # so per-row LN over the last dim commutes with row duplication).
        agg_n = _layer_norm(agg, ga, ba)                                   # (B, D)
        # Broadcast back onto feature rows via a tile-aligned reshape
        # (F = 8 = sublane height, D stays on lanes) — no selector matmul.
        x = (x.reshape(B, F_FEAT, D) + agg_n[:, None, :]).reshape(BF, D)

        # ---- FFN: Linear -> ReLU -> Linear, residual + LayerNorm ----
        h = jnp.maximum(jnp.dot(x, w1, preferred_element_type=jnp.float32) + b1, 0.0)
        y = jnp.dot(h, w2, preferred_element_type=jnp.float32) + b2
        x = x + _layer_norm(y, gf, bf)

    # ---- readout: bmm(x^T, I) as one block-diag (B, B*F) @ (B*F, D) matmul ----
    out_ref[...] = jnp.dot(i_rows, x, preferred_element_type=jnp.float32)


def _context_aggregator_fwd(X, I, S, params):
    """Full module forward. X, I, S: (B, F) int32; returns (B, D) float32."""
    emb_table, pos_emb, w1, b1, w2, b2, ga, ba, gf, bf = params
    Xf = X.astype(jnp.float32)
    Sf = S.astype(jnp.float32)
    If = I.astype(jnp.float32)

    # masked token ids (exact small ints, representable in f32)
    Xm = Xf * Sf + (1.0 - Sf) * float(N_VOCAB)                           # (B, F)

    # mask m = I + S, pre-scaled by 1/sum at trace time so the kernel's
    # aggregate matmul is already a mean; block-diagonal rows fold the batch
    # into a single 2-D matmul.
    m2 = If + Sf
    m_scaled = m2 / jnp.sum(m2, axis=1, keepdims=True)
    eye = jnp.eye(B, dtype=jnp.float32)                                  # constant under jit
    m_blk = (eye[:, :, None] * m_scaled[None, :, :]).reshape(B, BF)
    i_blk = (eye[:, :, None] * If[None, :, :]).reshape(B, BF)

    data = jnp.zeros((DATA_ROWS, D), jnp.float32)
    data = data.at[IDS_OFF:IDS_OFF + BF, 0].set(Xm.reshape(BF))
    data = data.at[M_OFF:M_OFF + B, 0:BF].set(m_blk)
    data = data.at[I_OFF:I_OFF + B, 0:BF].set(i_blk)

    w_rows = jnp.concatenate(
        [jnp.concatenate([w1[l], w2[l]], axis=0) for l in range(N_LAYERS)], axis=0)
    v_rows = jnp.concatenate(
        [jnp.concatenate([b1[l], b2[l], ga[l], ba[l], gf[l], bf[l]], axis=0)
         for l in range(N_LAYERS)], axis=0)

    par = jnp.zeros((PAR_ROWS, D), jnp.float32)
    par = par.at[EMB_OFF:EMB_OFF + N_VOCAB + 1, :].set(emb_table)
    par = par.at[POS_OFF:POS_OFF + F_FEAT, :].set(pos_emb)
    par = par.at[W_OFF:W_OFF + 2 * D * N_LAYERS, :].set(w_rows)
    par = par.at[V_OFF:V_OFF + 6 * N_LAYERS, :].set(v_rows)

    flops = (2 * BF * (N_VOCAB + 1) * D
             + N_LAYERS * (2 * B * BF * D + 2 * 2 * BF * D * D)
             + 2 * B * BF * D)
    return pl.pallas_call(
        ctx_agg_kernel,
        out_shape=jax.ShapeDtypeStruct((B, D), jnp.float32),
        in_specs=[pl.BlockSpec(memory_space=pltpu.MemorySpace.VMEM),
                  pl.BlockSpec(memory_space=pltpu.MemorySpace.VMEM)],
        out_specs=pl.BlockSpec(memory_space=pltpu.MemorySpace.VMEM),
        cost_estimate=pl.CostEstimate(
            flops=flops,
            transcendentals=N_LAYERS * (B + BF),
            bytes_accessed=(DATA_ROWS + PAR_ROWS + B) * D * 4),
    )(data, par)


# Jitted public entry point: host-side packing fuses / constant-folds.
context_aggregator_forward = jax.jit(_context_aggregator_fwd)


# ----------------------- pure-JAX reference (for check) ---------------------
def reference_forward(X, I, S, params):
    emb_table, pos_emb, w1, b1, w2, b2, ga, ba, gf, bf = params
    Xm = X * S + (1 - S) * N_VOCAB
    x = emb_table[Xm] + pos_emb[None, :, :]                # (B, F, D)
    m2 = (I + S).astype(jnp.float32)
    i2 = I.astype(jnp.float32)

    def ln(v, g, bt):
        mu = jnp.mean(v, axis=-1, keepdims=True)
        var = jnp.mean((v - mu) ** 2, axis=-1, keepdims=True)
        return (v - mu) * jax.lax.rsqrt(var + LN_EPS) * g + bt

    for l in range(N_LAYERS):
        num = jnp.einsum('bf,bfd->bd', m2, x)
        den = jnp.sum(m2, axis=1, keepdims=True)
        agg = num / den
        x_agg = jnp.broadcast_to(agg[:, None, :], x.shape)
        x = x + ln(x_agg, ga[l], ba[l])
        h = jnp.maximum(jnp.einsum('bfd,de->bfe', x, w1[l]) + b1[l], 0.0)
        y = jnp.einsum('bfd,de->bfe', h, w2[l]) + b2[l]
        x = x + ln(y, gf[l], bf[l])
    return jnp.einsum('bf,bfd->bd', i2, x)


if __name__ == "__main__":
    key = jax.random.PRNGKey(0)
    keys = jax.random.split(key, 10)

    # ---- deterministic synthetic parameters --------------------------------
    emb_table = jax.random.normal(keys[0], (N_VOCAB + 1, D), jnp.float32)   # tied embedding
    xavier_std = (2.0 / (F_FEAT + D)) ** 0.5
    pos_emb = xavier_std * jax.random.normal(keys[1], (F_FEAT, D), jnp.float32)

    w_scale = (1.0 / D) ** 0.5
    w1 = w_scale * jax.random.normal(keys[2], (N_LAYERS, D, D), jnp.float32)
    b1 = 0.01 * jax.random.normal(keys[3], (N_LAYERS, 1, D), jnp.float32)
    w2 = w_scale * jax.random.normal(keys[4], (N_LAYERS, D, D), jnp.float32)
    b2 = 0.01 * jax.random.normal(keys[5], (N_LAYERS, 1, D), jnp.float32)
    ga = jnp.ones((N_LAYERS, 1, D), jnp.float32)    # LayerNorm weight init = ones
    ba = jnp.zeros((N_LAYERS, 1, D), jnp.float32)   # LayerNorm bias init = zeros
    gf = jnp.ones((N_LAYERS, 1, D), jnp.float32)
    bf = jnp.zeros((N_LAYERS, 1, D), jnp.float32)
    params = (emb_table, pos_emb, w1, b1, w2, b2, ga, ba, gf, bf)

    # ---- deterministic synthetic inputs (X, I, S) ---------------------------
    X = jax.random.randint(keys[6], (B, F_FEAT), 0, N_VOCAB, jnp.int32)
    S = jax.random.bernoulli(keys[7], 0.6, (B, F_FEAT)).astype(jnp.int32)
    I = jax.random.bernoulli(keys[8], 0.5, (B, F_FEAT)).astype(jnp.int32)
    S = S.at[:, 0].set(1)   # ensure m = I + S is nonzero per row (mean well-defined)

    out = context_aggregator_forward(X, I, S, params)
    out = jax.block_until_ready(out)

    ref = reference_forward(X, I, S, params)
    assert out.shape == (B, D)
    assert jnp.allclose(out, ref, atol=1e-4, rtol=1e-4), "mismatch vs reference"
    print("KERNEL_OK")
</pallas_src>

<mosaic_0001>
module attributes {stable_mosaic.version = 11 : i64} {
  func.func @ctx_agg_kernel(%arg0: memref<24x32xf32, #tpu.memory_space<vmem>>, %arg1: memref<176x32xf32, #tpu.memory_space<vmem>>, %arg2: memref<2x32xf32, #tpu.memory_space<vmem>>) attributes {dimension_semantics = [], scalar_prefetch = 0 : i64, scratch_operands = 0 : i64, tpu.core_type = #tpu.core_type<tc>} {
    %c0 = arith.constant 0 : index
    %c0_0 = arith.constant 0 : index
    %0 = vector.load %arg0[%c0, %c0_0] : memref<24x32xf32, #tpu.memory_space<vmem>>, vector<24x32xf32>
    %1 = vector.extract_strided_slice %0 {offsets = [0, 0], sizes = [16, 1], strides = [1, 1]} : vector<24x32xf32> to vector<16x1xf32>
    %2 = vector.extract_strided_slice %0 {offsets = [16, 0], sizes = [2, 16], strides = [1, 1]} : vector<24x32xf32> to vector<2x16xf32>
    %3 = vector.extract_strided_slice %0 {offsets = [18, 0], sizes = [2, 16], strides = [1, 1]} : vector<24x32xf32> to vector<2x16xf32>
    %c0_1 = arith.constant 0 : index
    %c0_2 = arith.constant 0 : index
    %4 = vector.load %arg1[%c0_1, %c0_2] : memref<176x32xf32, #tpu.memory_space<vmem>>, vector<17x32xf32>
    %c24 = arith.constant 24 : index
    %c0_3 = arith.constant 0 : index
    %5 = vector.load %arg1[%c24, %c0_3] : memref<176x32xf32, #tpu.memory_space<vmem>>, vector<8x32xf32>
    %6 = tpu.iota {dimensions = array<i32: 1>} : vector<16x17xi32>
    %7 = arith.fptosi %1 : vector<16x1xf32> to vector<16x1xi32>
    %8 = vector.broadcast %7 : vector<16x1xi32> to vector<16x17xi32>
    %9 = arith.cmpi eq, %6, %8 : vector<16x17xi32>
    %10 = arith.extui %9 : vector<16x17xi1> to vector<16x17xi32>
    %11 = arith.sitofp %10 : vector<16x17xi32> to vector<16x17xf32>
    %cst = arith.constant dense<0.000000e+00> : vector<16x32xf32>
    %12 = tpu.matmul %11, %4, %cst {dimension_numbers = #tpu.dot_dimension_numbers<[1], [0], [0], [1], [0, 0, 1, 1], [], []>} : vector<16x17xf32>, vector<17x32xf32>, vector<16x32xf32> -> vector<16x32xf32>
    %13 = tpu.concatenate %5, %5 in 0 : vector<8x32xf32>, vector<8x32xf32> -> vector<16x32xf32>
    %14 = arith.addf %12, %13 : vector<16x32xf32>
    %c32 = arith.constant 32 : index
    %c0_4 = arith.constant 0 : index
    %15 = vector.load %arg1[%c32, %c0_4] : memref<176x32xf32, #tpu.memory_space<vmem>>, vector<32x32xf32>
    %c64 = arith.constant 64 : index
    %c0_5 = arith.constant 0 : index
    %16 = vector.load %arg1[%c64, %c0_5] : memref<176x32xf32, #tpu.memory_space<vmem>>, vector<32x32xf32>
    %c160 = arith.constant 160 : index
    %c0_6 = arith.constant 0 : index
    %17 = vector.load %arg1[%c160, %c0_6] : memref<176x32xf32, #tpu.memory_space<vmem>>, vector<1x32xf32>
    %c161 = arith.constant 161 : index
    %c0_7 = arith.constant 0 : index
    %18 = vector.load %arg1[%c161, %c0_7] : memref<176x32xf32, #tpu.memory_space<vmem>>, vector<1x32xf32>
    %c162 = arith.constant 162 : index
    %c0_8 = arith.constant 0 : index
    %19 = vector.load %arg1[%c162, %c0_8] : memref<176x32xf32, #tpu.memory_space<vmem>>, vector<1x32xf32>
    %c163 = arith.constant 163 : index
    %c0_9 = arith.constant 0 : index
    %20 = vector.load %arg1[%c163, %c0_9] : memref<176x32xf32, #tpu.memory_space<vmem>>, vector<1x32xf32>
    %c164 = arith.constant 164 : index
    %c0_10 = arith.constant 0 : index
    %21 = vector.load %arg1[%c164, %c0_10] : memref<176x32xf32, #tpu.memory_space<vmem>>, vector<1x32xf32>
    %c165 = arith.constant 165 : index
    %c0_11 = arith.constant 0 : index
    %22 = vector.load %arg1[%c165, %c0_11] : memref<176x32xf32, #tpu.memory_space<vmem>>, vector<1x32xf32>
    %cst_12 = arith.constant dense<0.000000e+00> : vector<2x32xf32>
    %23 = tpu.matmul %2, %14, %cst_12 {dimension_numbers = #tpu.dot_dimension_numbers<[1], [0], [0], [1], [0, 0, 1, 1], [], []>} : vector<2x16xf32>, vector<16x32xf32>, vector<2x32xf32> -> vector<2x32xf32>
    %cst_13 = arith.constant dense<0.000000e+00> : vector<2xf32>
    %24 = vector.multi_reduction <add>, %23, %cst_13 [1] : vector<2x32xf32> to vector<2xf32>
    %25 = vector.shape_cast %24 : vector<2xf32> to vector<2x1xf32>
    %cst_14 = arith.constant 3.200000e+01 : f32
    %26 = vector.broadcast %cst_14 : f32 to vector<2x1xf32>
    %27 = arith.divf %25, %26 : vector<2x1xf32>
    %28 = vector.broadcast %27 : vector<2x1xf32> to vector<2x32xf32>
    %29 = arith.subf %23, %28 : vector<2x32xf32>
    %30 = arith.mulf %29, %29 : vector<2x32xf32>
    %cst_15 = arith.constant dense<0.000000e+00> : vector<2xf32>
    %31 = vector.multi_reduction <add>, %30, %cst_15 [1] : vector<2x32xf32> to vector<2xf32>
    %32 = vector.shape_cast %31 : vector<2xf32> to vector<2x1xf32>
    %cst_16 = arith.constant 3.200000e+01 : f32
    %33 = vector.broadcast %cst_16 : f32 to vector<2x1xf32>
    %34 = arith.divf %32, %33 : vector<2x1xf32>
    %35 = vector.broadcast %27 : vector<2x1xf32> to vector<2x32xf32>
    %36 = arith.subf %23, %35 : vector<2x32xf32>
    %cst_17 = arith.constant 9.99999974E-6 : f32
    %37 = vector.broadcast %cst_17 : f32 to vector<2x1xf32>
    %38 = arith.addf %34, %37 : vector<2x1xf32>
    %39 = math.rsqrt %38 : vector<2x1xf32>
    %40 = vector.broadcast %39 : vector<2x1xf32> to vector<2x32xf32>
    %41 = arith.mulf %36, %40 : vector<2x32xf32>
    %42 = vector.broadcast %19 : vector<1x32xf32> to vector<2x32xf32>
    %43 = arith.mulf %41, %42 : vector<2x32xf32>
    %44 = vector.broadcast %20 : vector<1x32xf32> to vector<2x32xf32>
    %45 = arith.addf %43, %44 : vector<2x32xf32>
    %46 = vector.shape_cast %14 : vector<16x32xf32> to vector<2x8x32xf32>
    %47 = vector.shape_cast %45 : vector<2x32xf32> to vector<2x1x32xf32>
    %48 = vector.broadcast %47 : vector<2x1x32xf32> to vector<2x8x32xf32>
    %49 = arith.addf %46, %48 : vector<2x8x32xf32>
    %50 = vector.shape_cast %49 : vector<2x8x32xf32> to vector<16x32xf32>
    %cst_18 = arith.constant dense<0.000000e+00> : vector<16x32xf32>
    %51 = tpu.matmul %50, %15, %cst_18 {dimension_numbers = #tpu.dot_dimension_numbers<[1], [0], [0], [1], [0, 0, 1, 1], [], []>} : vector<16x32xf32>, vector<32x32xf32>, vector<16x32xf32> -> vector<16x32xf32>
    %52 = vector.broadcast %17 : vector<1x32xf32> to vector<16x32xf32>
    %53 = arith.addf %51, %52 : vector<16x32xf32>
    %cst_19 = arith.constant 0.000000e+00 : f32
    %54 = vector.broadcast %cst_19 : f32 to vector<16x32xf32>
    %55 = arith.maximumf %53, %54 : vector<16x32xf32>
    %cst_20 = arith.constant dense<0.000000e+00> : vector<16x32xf32>
    %56 = tpu.matmul %55, %16, %cst_20 {dimension_numbers = #tpu.dot_dimension_numbers<[1], [0], [0], [1], [0, 0, 1, 1], [], []>} : vector<16x32xf32>, vector<32x32xf32>, vector<16x32xf32> -> vector<16x32xf32>
    %57 = vector.broadcast %18 : vector<1x32xf32> to vector<16x32xf32>
    %58 = arith.addf %56, %57 : vector<16x32xf32>
    %cst_21 = arith.constant dense<0.000000e+00> : vector<16xf32>
    %59 = vector.multi_reduction <add>, %58, %cst_21 [1] : vector<16x32xf32> to vector<16xf32>
    %60 = vector.shape_cast %59 : vector<16xf32> to vector<16x1xf32>
    %cst_22 = arith.constant 3.200000e+01 : f32
    %61 = vector.broadcast %cst_22 : f32 to vector<16x1xf32>
    %62 = arith.divf %60, %61 : vector<16x1xf32>
    %63 = vector.broadcast %62 : vector<16x1xf32> to vector<16x32xf32>
    %64 = arith.subf %58, %63 : vector<16x32xf32>
    %65 = arith.mulf %64, %64 : vector<16x32xf32>
    %cst_23 = arith.constant dense<0.000000e+00> : vector<16xf32>
    %66 = vector.multi_reduction <add>, %65, %cst_23 [1] : vector<16x32xf32> to vector<16xf32>
    %67 = vector.shape_cast %66 : vector<16xf32> to vector<16x1xf32>
    %cst_24 = arith.constant 3.200000e+01 : f32
    %68 = vector.broadcast %cst_24 : f32 to vector<16x1xf32>
    %69 = arith.divf %67, %68 : vector<16x1xf32>
    %70 = vector.broadcast %62 : vector<16x1xf32> to vector<16x32xf32>
    %71 = arith.subf %58, %70 : vector<16x32xf32>
    %cst_25 = arith.constant 9.99999974E-6 : f32
    %72 = vector.broadcast %cst_25 : f32 to vector<16x1xf32>
    %73 = arith.addf %69, %72 : vector<16x1xf32>
    %74 = math.rsqrt %73 : vector<16x1xf32>
    %75 = vector.broadcast %74 : vector<16x1xf32> to vector<16x32xf32>
    %76 = arith.mulf %71, %75 : vector<16x32xf32>
    %77 = vector.broadcast %21 : vector<1x32xf32> to vector<16x32xf32>
    %78 = arith.mulf %76, %77 : vector<16x32xf32>
    %79 = vector.broadcast %22 : vector<1x32xf32> to vector<16x32xf32>
    %80 = arith.addf %78, %79 : vector<16x32xf32>
    %81 = arith.addf %50, %80 : vector<16x32xf32>
    %c96 = arith.constant 96 : index
    %c0_26 = arith.constant 0 : index
    %82 = vector.load %arg1[%c96, %c0_26] : memref<176x32xf32, #tpu.memory_space<vmem>>, vector<32x32xf32>
    %c128 = arith.constant 128 : index
    %c0_27 = arith.constant 0 : index
    %83 = vector.load %arg1[%c128, %c0_27] : memref<176x32xf32, #tpu.memory_space<vmem>>, vector<32x32xf32>
    %c166 = arith.constant 166 : index
    %c0_28 = arith.constant 0 : index
    %84 = vector.load %arg1[%c166, %c0_28] : memref<176x32xf32, #tpu.memory_space<vmem>>, vector<1x32xf32>
    %c167 = arith.constant 167 : index
    %c0_29 = arith.constant 0 : index
    %85 = vector.load %arg1[%c167, %c0_29] : memref<176x32xf32, #tpu.memory_space<vmem>>, vector<1x32xf32>
    %c168 = arith.constant 168 : index
    %c0_30 = arith.constant 0 : index
    %86 = vector.load %arg1[%c168, %c0_30] : memref<176x32xf32, #tpu.memory_space<vmem>>, vector<1x32xf32>
    %c169 = arith.constant 169 : index
    %c0_31 = arith.constant 0 : index
    %87 = vector.load %arg1[%c169, %c0_31] : memref<176x32xf32, #tpu.memory_space<vmem>>, vector<1x32xf32>
    %c170 = arith.constant 170 : index
    %c0_32 = arith.constant 0 : index
    %88 = vector.load %arg1[%c170, %c0_32] : memref<176x32xf32, #tpu.memory_space<vmem>>, vector<1x32xf32>
    %c171 = arith.constant 171 : index
    %c0_33 = arith.constant 0 : index
    %89 = vector.load %arg1[%c171, %c0_33] : memref<176x32xf32, #tpu.memory_space<vmem>>, vector<1x32xf32>
    %cst_34 = arith.constant dense<0.000000e+00> : vector<2x32xf32>
    %90 = tpu.matmul %2, %81, %cst_34 {dimension_numbers = #tpu.dot_dimension_numbers<[1], [0], [0], [1], [0, 0, 1, 1], [], []>} : vector<2x16xf32>, vector<16x32xf32>, vector<2x32xf32> -> vector<2x32xf32>
    %cst_35 = arith.constant dense<0.000000e+00> : vector<2xf32>
    %91 = vector.multi_reduction <add>, %90, %cst_35 [1] : vector<2x32xf32> to vector<2xf32>
    %92 = vector.shape_cast %91 : vector<2xf32> to vector<2x1xf32>
    %cst_36 = arith.constant 3.200000e+01 : f32
    %93 = vector.broadcast %cst_36 : f32 to vector<2x1xf32>
    %94 = arith.divf %92, %93 : vector<2x1xf32>
    %95 = vector.broadcast %94 : vector<2x1xf32> to vector<2x32xf32>
    %96 = arith.subf %90, %95 : vector<2x32xf32>
    %97 = arith.mulf %96, %96 : vector<2x32xf32>
    %cst_37 = arith.constant dense<0.000000e+00> : vector<2xf32>
    %98 = vector.multi_reduction <add>, %97, %cst_37 [1] : vector<2x32xf32> to vector<2xf32>
    %99 = vector.shape_cast %98 : vector<2xf32> to vector<2x1xf32>
    %cst_38 = arith.constant 3.200000e+01 : f32
    %100 = vector.broadcast %cst_38 : f32 to vector<2x1xf32>
    %101 = arith.divf %99, %100 : vector<2x1xf32>
    %102 = vector.broadcast %94 : vector<2x1xf32> to vector<2x32xf32>
    %103 = arith.subf %90, %102 : vector<2x32xf32>
    %cst_39 = arith.constant 9.99999974E-6 : f32
    %104 = vector.broadcast %cst_39 : f32 to vector<2x1xf32>
    %105 = arith.addf %101, %104 : vector<2x1xf32>
    %106 = math.rsqrt %105 : vector<2x1xf32>
    %107 = vector.broadcast %106 : vector<2x1xf32> to vector<2x32xf32>
    %108 = arith.mulf %103, %107 : vector<2x32xf32>
    %109 = vector.broadcast %86 : vector<1x32xf32> to vector<2x32xf32>
    %110 = arith.mulf %108, %109 : vector<2x32xf32>
    %111 = vector.broadcast %87 : vector<1x32xf32> to vector<2x32xf32>
    %112 = arith.addf %110, %111 : vector<2x32xf32>
    %113 = vector.shape_cast %81 : vector<16x32xf32> to vector<2x8x32xf32>
    %114 = vector.shape_cast %112 : vector<2x32xf32> to vector<2x1x32xf32>
    %115 = vector.broadcast %114 : vector<2x1x32xf32> to vector<2x8x32xf32>
    %116 = arith.addf %113, %115 : vector<2x8x32xf32>
    %117 = vector.shape_cast %116 : vector<2x8x32xf32> to vector<16x32xf32>
    %cst_40 = arith.constant dense<0.000000e+00> : vector<16x32xf32>
    %118 = tpu.matmul %117, %82, %cst_40 {dimension_numbers = #tpu.dot_dimension_numbers<[1], [0], [0], [1], [0, 0, 1, 1], [], []>} : vector<16x32xf32>, vector<32x32xf32>, vector<16x32xf32> -> vector<16x32xf32>
    %119 = vector.broadcast %84 : vector<1x32xf32> to vector<16x32xf32>
    %120 = arith.addf %118, %119 : vector<16x32xf32>
    %cst_41 = arith.constant 0.000000e+00 : f32
    %121 = vector.broadcast %cst_41 : f32 to vector<16x32xf32>
    %122 = arith.maximumf %120, %121 : vector<16x32xf32>
    %cst_42 = arith.constant dense<0.000000e+00> : vector<16x32xf32>
    %123 = tpu.matmul %122, %83, %cst_42 {dimension_numbers = #tpu.dot_dimension_numbers<[1], [0], [0], [1], [0, 0, 1, 1], [], []>} : vector<16x32xf32>, vector<32x32xf32>, vector<16x32xf32> -> vector<16x32xf32>
    %124 = vector.broadcast %85 : vector<1x32xf32> to vector<16x32xf32>
    %125 = arith.addf %123, %124 : vector<16x32xf32>
    %cst_43 = arith.constant dense<0.000000e+00> : vector<16xf32>
    %126 = vector.multi_reduction <add>, %125, %cst_43 [1] : vector<16x32xf32> to vector<16xf32>
    %127 = vector.shape_cast %126 : vector<16xf32> to vector<16x1xf32>
    %cst_44 = arith.constant 3.200000e+01 : f32
    %128 = vector.broadcast %cst_44 : f32 to vector<16x1xf32>
    %129 = arith.divf %127, %128 : vector<16x1xf32>
    %130 = vector.broadcast %129 : vector<16x1xf32> to vector<16x32xf32>
    %131 = arith.subf %125, %130 : vector<16x32xf32>
    %132 = arith.mulf %131, %131 : vector<16x32xf32>
    %cst_45 = arith.constant dense<0.000000e+00> : vector<16xf32>
    %133 = vector.multi_reduction <add>, %132, %cst_45 [1] : vector<16x32xf32> to vector<16xf32>
    %134 = vector.shape_cast %133 : vector<16xf32> to vector<16x1xf32>
    %cst_46 = arith.constant 3.200000e+01 : f32
    %135 = vector.broadcast %cst_46 : f32 to vector<16x1xf32>
    %136 = arith.divf %134, %135 : vector<16x1xf32>
    %137 = vector.broadcast %129 : vector<16x1xf32> to vector<16x32xf32>
    %138 = arith.subf %125, %137 : vector<16x32xf32>
    %cst_47 = arith.constant 9.99999974E-6 : f32
    %139 = vector.broadcast %cst_47 : f32 to vector<16x1xf32>
    %140 = arith.addf %136, %139 : vector<16x1xf32>
    %141 = math.rsqrt %140 : vector<16x1xf32>
    %142 = vector.broadcast %141 : vector<16x1xf32> to vector<16x32xf32>
    %143 = arith.mulf %138, %142 : vector<16x32xf32>
    %144 = vector.broadcast %88 : vector<1x32xf32> to vector<16x32xf32>
    %145 = arith.mulf %143, %144 : vector<16x32xf32>
    %146 = vector.broadcast %89 : vector<1x32xf32> to vector<16x32xf32>
    %147 = arith.addf %145, %146 : vector<16x32xf32>
    %148 = arith.addf %117, %147 : vector<16x32xf32>
    %cst_48 = arith.constant dense<0.000000e+00> : vector<2x32xf32>
    %149 = tpu.matmul %3, %148, %cst_48 {dimension_numbers = #tpu.dot_dimension_numbers<[1], [0], [0], [1], [0, 0, 1, 1], [], []>} : vector<2x16xf32>, vector<16x32xf32>, vector<2x32xf32> -> vector<2x32xf32>
    %c0_49 = arith.constant 0 : index
    %c0_50 = arith.constant 0 : index
    %150 = vector.load %arg2[%c0_49, %c0_50] : memref<2x32xf32, #tpu.memory_space<vmem>>, vector<2x32xf32>
    tpu.vector_store %arg2[%c0_49, %c0_50], %149 {strides = array<i32>} : memref<2x32xf32, #tpu.memory_space<vmem>>, vector<2x32xf32>,
    return
  }
}

</mosaic_0001>

<bundles_post_ra>
// kernel: _context_aggregator_fwd.1
= control target key start
LH: loop header
LB: loop body
LE: loop exit
PB: predicated region body
PF: predicated region fallthrough
CT: control target
= control target key end

     0   :  { %v1156_v2 = vmov 0   ;;  %s1348_s0 = inlined_call_operand.vmem [shape: f32[24,32], index: 0, kind: input, shape index: {}]   ;;  %s1349_s1 = inlined_call_operand.vmem [shape: f32[176,32], index: 1, kind: input, shape index: {}]   ;;  %s1350_s2 = inlined_call_operand.hbm [shape: f32[2,32], index: 2, kind: output, shape index: {}]  }
   0x1   :  { %v12_v0 = vld [vmem:[%s1348_s0] sm:$0xff]  ;;  %v13_v1 = vld [vmem:[%s1348_s0 + $0x8] sm:$0xff]  ;;  %1119 = vset.pattern.permute.xlu0 %v1156_v2 }
   0x2   :  { %v1109_v3 = vtrunc.f32 %v12_v0  ;;  %v1111_v4 = vtrunc.f32 %v13_v1 }
   0x3   :  { %7 = vsyncpa [#allocation3], 0  ;;  %v15_v5 = vld [vmem:[%s1349_s1] sm:$0xff]  ;;  %v16_v6 = vld [vmem:[%s1349_s1 + $0x8] sm:$0xff]  ;;  %vm42_vm0 = vcmask 1040384   ;;  %v19_v11 = vlaneseq  ;;  %vm35_vm1 = vcmask 138240  }
   0x4   :  { %v1110_v7 = vcvt.f32.s32 %v1109_v3  ;;  %v1064_v8 = vpack.c.bf16 %v16_v6, %v15_v5  ;;  %v1112_v9 = vcvt.f32.s32 %v1111_v4  ;;  %v17_v10 = vld [vmem:[%s1349_s1 + $0x10] sm:$0x1]  ;;  %v1157_v14 = vmov 0.0   ;;  %v18_v19 = vld [vmem:[%s1349_s1 + $0x18] sm:$0xff]  ;;  %v121_v34 = vld [vmem:[%s1349_s1 + $0x20] sm:$0xff]  ;;  %s1161_s21 = smov [#allocation2]  }
   0x5   :  { %v20_v12 = vand.u32 127, %v19_v11  ;;  %v1158_v18 = vmov 0.0|0.0   ;;  %vm1159_vm4 = vmmov 0   ;;  %v1203_v25 = vld [vmem:[%s1348_s0 + $0x10] sm:$0xff]  ;;  %vm135_vm5 = vcmask 130048   ;;  %v122_v35 = vld [vmem:[%s1349_s1 + $0x28] sm:$0xff] }
   0x6   :  { %24 = vperm.xlu0 %1119, %v1110_v7   ;;  %1065 = vmatprep.subr.bf16.mxu0 %v1064_v8  ;;  %vm209_vm6 = vcmask 254976   ;;  %v123_v36 = vld [vmem:[%s1349_s1 + $0x30] sm:$0xff]  ;;  %v1071_v37 = vpack.c.bf16 %v122_v35, %v121_v34  ;;  %v124_v38 = vld [vmem:[%s1349_s1 + $0x38] sm:$0xff]  ;;  %v125_v40 = vld [vmem:[%s1349_s1 + $0x40] sm:$0xff]  ;;  %v1160_v46 = vmov 1966171168  }
   0x7   :  { %1067 = vmatpush3.bf16.msra.mxu0 %v1064_v8  ;;  %1068 = vmatprep.subr.bf16.mxu1 %v1158_v18  ;;  %v1075_v39 = vpack.c.bf16 %v124_v38, %v123_v36  ;;  %v126_v41 = vld [vmem:[%s1349_s1 + $0x48] sm:$0xff]  ;;  %v236_v47 = vunpack.c.l.s4 %v1160_v46  ;;  %v239_v49 = vshrl.u32 %v19_v11, 7  ;;  %v930_v51 = vld [vmem:[%s1349_s1 + $0xa2] ss:$0 sm:$0xff]  ;;  %v931_v53 = vld [vmem:[%s1349_s1 + $0xa3] ss:$0 sm:$0xff] }
   0x8   :  { %994 = vmatprep.subr.msk.mxu0 %vm42_vm0, %v17_v10  ;;  %1003 = vmatprep.mubr.msk.f32.mxu1 %vm1159_vm4, %v1157_v14  ;;  %v1079_v42 = vpack.c.bf16 %v126_v41, %v125_v40  ;;  %vm273_vm7 = vcmask 261120   ;;  %v127_v2 = vld [vmem:[%s1349_s1 + $0x50] sm:$0xff]  ;;  %v128_v3 = vld [vmem:[%s1349_s1 + $0x58] sm:$0xff]  ;;  %v932_v5 = vld [vmem:[%s1349_s1 + $0xa0] ss:$0 sm:$0xff]  ;;  %s916_s22 = sshll.u32 %s1161_s21, 4  ;;  %s917_s22 = int_to_ptr.vmem [resolvable:$true] %s916_s22 }
   0x9   :  { %v237_v48 = vunpack.c.0.s8 %v236_v47  ;;  %v1236_v57 = vsub.s32 0, %v239_v49  ;;  %v1083_v4 = vpack.c.bf16 %v128_v3, %v127_v2  ;;  %v486_v3 = vld [vmem:[%s1349_s1 + $0x80] sm:$0xff]  ;;  %p1137_p1 = scmp.lt.s32.totalorder %s917_s22, %s917_s22 }
   0xa   :  { %27 = vperm.xlu0 %1119, %v1112_v9  }
   0xb   :  { %995 = vmatpush3.msk.msra.mxu0 %vm42_vm0, %v17_v10  ;;  %v1234_v54 = vsub.s32 %v237_v48, %v239_v49 }
   0xc   :  { %1080 = vmatprep.subr.bf16.mxu0 %v1079_v42 }
  0x85   :  { %v25_v13 = vpop.permute.xlu0 %24 }
  0x86   :  { %vm29_vm2 = vcmp.eq.s32.totalorder %v20_v12, %v25_v13 }
  0x87   :  { %v924_v15 = vsel %vm29_vm2, 1.0, %v1157_v14 }
  0x88   :  { %996 = vmatprep.mubr.msk.f32.mxu0 %vm35_vm1, %v924_v15 }
  0x89   :  { %v28_v16 = vpop.permute.xlu0 %27 }
  0x8a   :  { %vm30_vm3 = vcmp.eq.s32.totalorder %v20_v12, %v28_v16  ;;  %v935_v12 = vld [vmem:[%s1349_s1 + $0xa1] ss:$0 sm:$0xff] }
  0x8b   :  { %v925_v17 = vsel %vm30_vm3, 1.0, %v1157_v14 }
  0x8c   :  { %997 = vmatmul.mubr.msk.f32.vlgmr.msra.gmra.mrb[0].mxu0 %vm35_vm1, %v925_v17 }
  0x8d   :  { %1082 = vmatpush3.bf16.msra.mxu0 %v1079_v42 }
  0x8e   :  { %1084 = vmatprep.subr.bf16.mxu0 %v1083_v4 }
  0x91   :  { %1086 = vmatpush3.bf16.msra.mxu0 %v1083_v4  ;;  %v487_v4 = vld [vmem:[%s1349_s1 + $0x88] sm:$0xff] }
 0x15f   :  { %v998_v20 = vpop.f32.mrb[0].mxu0 }
 0x160   :  { %v118_v21 = vadd.f32 %v998_v20, %v18_v19  ;;  %v112_v22 = vpop.f32.mrb[1].mxu0 }
 0x161   :  { %v113_v23 = vadd.f32 %v112_v22, %v18_v19 }
 0x163   :  { %v1069_v24 = vpack.c.bf16 %v118_v21, %v113_v23 }
 0x165   :  { %1070 = vmatpush3.bf16.msra.mxu1 %v1069_v24 }
 0x166   :  { %1072 = vmatprep.subr.bf16.mxu1 %v1071_v37 }
 0x168   :  { %1004 = vmatmul.mubr.msk.f32.vlgmr.msra.gmra.mrb[0].mxu1 %vm135_vm5, %v1203_v25 }
 0x169   :  { %1074 = vmatpush3.bf16.msra.mxu1 %v1071_v37 }
 0x16a   :  { %1076 = vmatprep.subr.bf16.mxu1 %v1075_v39 }
 0x16d   :  { %1078 = vmatpush3.bf16.msra.mxu1 %v1075_v39  ;;  %v938_v39 = vld [vmem:[%s1349_s1 + $0xa4] ss:$0 sm:$0xff] }
 0x16e   :  { %1087 = vmatprep.subr.bf16.mxu1 %v1158_v18 }
 0x23b   :  { %v205_v26 = vpop.f32.mrb[0].mxu1 }
 0x23c   :  { %v1005_v27 = vpop.f32.mrb[1].mxu1  ;;  %v210_v28 = vsel %vm209_vm6, %v205_v26, 0.0 }
 0x23d   :  { %211 = vadd.xlane.f32.xlu1 %v210_v28 }
 0x2ca   :  { %v212_v29 = vpop.xlane.xlu1 %211 }
 0x2cb   :  { %v214_v30 = vmul.f32 0.03125, %v212_v29 }
 0x2cd   :  { %v215_v31 = vsub.f32 %v205_v26, %v214_v30 }
 0x2cf   :  { %v216_v32 = vmul.f32 %v215_v31, %v215_v31 }
 0x2d1   :  { %v217_v33 = vsel %vm209_vm6, %v216_v32, 0.0 }
 0x2d2   :  { %218 = vadd.xlane.f32.xlu1 %v217_v33 }
 0x35f   :  { %v219_v43 = vpop.xlane.xlu1 %218 }
 0x360   :  { %v220_v44 = vmul.f32 0.03125, %v219_v43  ;;  %v939_v43 = vld [vmem:[%s1349_s1 + $0xa5] ss:$0 sm:$0xff] }
 0x362   :  { %v221_v45 = vadd.f32 1e-05, %v220_v44 }
 0x364   :  { %1120 = vrsqrt.f32 %v221_v45 }
 0x36e   :  { %v1121_v50 = vpop.eup %1120 }
 0x36f   :  { %v223_v52 = vmul.f32 %v1121_v50, %v215_v31 }
 0x371   :  { %v228_v55 = vmul.f32 %v930_v51, %v223_v52 }
 0x373   :  { %v233_v56 = vadd.f32 %v931_v53, %v228_v55 }
 0x375   :  { %v241_v58 = vrot.slane %v233_v56, %v1234_v54 }
 0x377   :  { %v242_v59 = vcombine.high %v241_v58, %v241_v58  ;;  %v249_v60 = vrot.slane %v241_v58, %v1234_v54 }
 0x379   :  { %v260_v61 = vrot.slane %v249_v60, %v1236_v57  ;;  %v256_v62 = vrot.slane %v242_v59, %v1234_v54 }
 0x37b   :  { %v267_v63 = vadd.f32 %v260_v61, %v113_v23  ;;  %v264_v0 = vrot.slane %v256_v62, %v1236_v57  ;;  %v482_v61 = vld [vmem:[%s1349_s1 + $0x60] sm:$0xff]  ;;  %v483_v62 = vld [vmem:[%s1349_s1 + $0x68] sm:$0xff] }
 0x37d   :  { %1014 = vmatprep.mubr.msk.f32.mxu1 %vm273_vm7, %v267_v63  ;;  %v268_v1 = vadd.f32 %v264_v0, %v118_v21  ;;  %v1090_v0 = vpack.c.bf16 %v483_v62, %v482_v61  ;;  %v950_v62 = vld [vmem:[%s1349_s1 + $0xab] ss:$0 sm:$0xff] }
 0x37f   :  { %1015 = vmatmul.mubr.msk.f32.vlgmr.msra.gmra.mrb[2].mxu1 %vm273_vm7, %v268_v1  ;;  %1091 = vmatprep.subr.bf16.mxu0 %v1090_v0 }
 0x380   :  { %1032 = vmatprep.mubr.msk.f32.mxu1 %vm1159_vm4, %v1157_v14 }
 0x452   :  { %v1016_v6 = vpop.f32.mrb[2].mxu1 }
 0x453   :  { %v352_v7 = vadd.f32 %v1016_v6, %v932_v5  ;;  %v346_v8 = vpop.f32.mrb[3].mxu1 }
 0x454   :  { %v347_v9 = vadd.f32 %v932_v5, %v346_v8  ;;  %v1098_v5 = vpack.c.bf16 %v487_v4, %v486_v3 }
 0x455   :  { %v356_v11 = vmax.f32 %v352_v7, 0.0 }
 0x456   :  { %v355_v10 = vmax.f32 %v347_v9, 0.0 }
 0x458   :  { %1025 = vmatprep.mubr.msk.f32.mxu0 %vm273_vm7, %v355_v10 }
 0x459   :  { %1026 = vmatmul.mubr.msk.f32.vlgmr.msra.gmra.mrb[2].mxu0 %vm273_vm7, %v356_v11  ;;  %v942_v11 = vld [vmem:[%s1349_s1 + $0xa9] ss:$0 sm:$0xff] }
 0x45a   :  { %1093 = vmatpush3.bf16.msra.mxu0 %v1090_v0 }
 0x52c   :  { %v1027_v13 = vpop.f32.mrb[2].mxu0 }
 0x52d   :  { %v439_v15 = vadd.f32 %v1027_v13, %v935_v12  ;;  %v433_v16 = vpop.f32.mrb[3].mxu0 }
 0x52e   :  { %v434_v17 = vadd.f32 %v935_v12, %v433_v16 }
 0x52f   :  { %v445_v19 = vsel %vm273_vm7, %v439_v15, 0.0 }
 0x530   :  { %446 = vadd.xlane.f32.xlu1 %v445_v19  ;;  %v442_v20 = vsel %vm273_vm7, %v434_v17, 0.0 }
 0x531   :  { %443 = vadd.xlane.f32.xlu0 %v442_v20 }
 0x5bd   :  { %v447_v21 = vpop.xlane.xlu1 %446 }
 0x5be   :  { %v449_v22 = vmul.f32 0.03125, %v447_v21  ;;  %v444_v23 = vpop.xlane.xlu0 %443 }
 0x5bf   :  { %v448_v24 = vmul.f32 0.03125, %v444_v23 }
 0x5c0   :  { %v451_v26 = vsub.f32 %v439_v15, %v449_v22 }
 0x5c1   :  { %v450_v27 = vsub.f32 %v434_v17, %v448_v24  ;;  %v488_v24 = vld [vmem:[%s1349_s1 + $0x90] sm:$0xff] }
 0x5c2   :  { %v453_v30 = vmul.f32 %v451_v26, %v451_v26 }
 0x5c3   :  { %v452_v28 = vmul.f32 %v450_v27, %v450_v27 }
 0x5c4   :  { %v457_v31 = vsel %vm273_vm7, %v453_v30, 0.0 }
 0x5c5   :  { %v454_v29 = vsel %vm273_vm7, %v452_v28, 0.0 }
 0x5c6   :  { %455 = vadd.xlane.f32.xlu1 %v454_v29 }
 0x5ca   :  { %458 = vadd.xlane.f32.xlu1 %v457_v31 }
 0x653   :  { %v456_v32 = vpop.xlane.xlu1 %455 }
 0x654   :  { %v460_v33 = vmul.f32 0.03125, %v456_v32  ;;  %v946_v32 = vld [vmem:[%s1349_s1 + $0xa7] ss:$0 sm:$0xff] }
 0x656   :  { %v462_v34 = vadd.f32 1e-05, %v460_v33 }
 0x657   :  { %v459_v35 = vpop.xlane.xlu1 %458 }
 0x658   :  { %1122 = vrsqrt.f32 %v462_v34  ;;  %v461_v36 = vmul.f32 0.03125, %v459_v35 }
 0x65a   :  { %v463_v37 = vadd.f32 1e-05, %v461_v36 }
 0x65c   :  { %1124 = vrsqrt.f32 %v463_v37 }
 0x662   :  { %v1123_v38 = vpop.eup %1122 }
 0x663   :  { %v466_v40 = vmul.f32 %v1123_v38, %v450_v27 }
 0x665   :  { %v472_v41 = vmul.f32 %v938_v39, %v466_v40 }
 0x666   :  { %v1125_v42 = vpop.eup %1124 }
 0x667   :  { %v467_v44 = vmul.f32 %v1125_v42, %v451_v26  ;;  %v478_v46 = vadd.f32 %v939_v43, %v472_v41  ;;  %v489_v26 = vld [vmem:[%s1349_s1 + $0x98] sm:$0xff] }
 0x669   :  { %v473_v45 = vmul.f32 %v938_v39, %v467_v44  ;;  %v480_v48 = vadd.f32 %v478_v46, %v267_v63  ;;  %v484_v63 = vld [vmem:[%s1349_s1 + $0x70] sm:$0xff] }
 0x66b   :  { %v479_v47 = vadd.f32 %v939_v43, %v473_v45 }
 0x66d   :  { %v481_v49 = vadd.f32 %v479_v47, %v268_v1  ;;  %v485_v1 = vld [vmem:[%s1349_s1 + $0x78] sm:$0xff] }
 0x66e   :  { %v1094_v2 = vpack.c.bf16 %v485_v1, %v484_v63 }
 0x66f   :  { %v1088_v50 = vpack.c.bf16 %v481_v49, %v480_v48 }
 0x670   :  { %1095 = vmatprep.subr.bf16.mxu0 %v1094_v2 }
 0x671   :  { %1089 = vmatpush3.bf16.msra.mxu1 %v1088_v50  ;;  %1097 = vmatpush3.bf16.msra.mxu0 %v1094_v2 }
 0x672   :  { %1106 = vmatprep.subr.bf16.mxu0 %v1158_v18  ;;  %1099 = vmatprep.subr.bf16.mxu1 %v1098_v5  ;;  %v941_v18 = vld [vmem:[%s1349_s1 + $0xa8] ss:$0 sm:$0xff] }
 0x674   :  { %1033 = vmatmul.mubr.msk.f32.vlgmr.msra.gmra.mrb[4].mxu1 %vm135_vm5, %v1203_v25 }
 0x675   :  { %1101 = vmatpush3.bf16.msra.mxu1 %v1098_v5 }
 0x747   :  { %v562_v51 = vpop.f32.mrb[4].mxu1 }
 0x748   :  { %v1034_v52 = vpop.f32.mrb[5].mxu1  ;;  %v566_v53 = vsel %vm209_vm6, %v562_v51, 0.0 }
 0x749   :  { %567 = vadd.xlane.f32.xlu1 %v566_v53 }
 0x7d6   :  { %v568_v55 = vpop.xlane.xlu1 %567 }
 0x7d7   :  { %v569_v56 = vmul.f32 0.03125, %v568_v55 }
 0x7d9   :  { %v570_v58 = vsub.f32 %v562_v51, %v569_v56 }
 0x7db   :  { %v571_v59 = vmul.f32 %v570_v58, %v570_v58 }
 0x7dd   :  { %v572_v60 = vsel %vm209_vm6, %v571_v59, 0.0 }
 0x7de   :  { %573 = vadd.xlane.f32.xlu1 %v572_v60 }
 0x86b   :  { %v574_v6 = vpop.xlane.xlu1 %573 }
 0x86c   :  { %v575_v7 = vmul.f32 0.03125, %v574_v6  ;;  %v836_v6 = vrot.slane %v1203_v25, 2 }
 0x86e   :  { %v576_v8 = vadd.f32 1e-05, %v575_v7 }
 0x870   :  { %1126 = vrsqrt.f32 %v576_v8 }
 0x87a   :  { %v1127_v9 = vpop.eup %1126 }
 0x87b   :  { %v578_v10 = vmul.f32 %v1127_v9, %v570_v58  ;;  %v949_v58 = vld [vmem:[%s1349_s1 + $0xaa] ss:$0 sm:$0xff] }
 0x87d   :  { %v583_v12 = vmul.f32 %v941_v18, %v578_v10 }
 0x87f   :  { %v588_v13 = vadd.f32 %v942_v11, %v583_v12 }
 0x881   :  { %v596_v15 = vrot.slane %v588_v13, %v1234_v54 }
 0x883   :  { %v597_v16 = vcombine.high %v596_v15, %v596_v15  ;;  %v604_v17 = vrot.slane %v596_v15, %v1234_v54 }
 0x885   :  { %v615_v19 = vrot.slane %v604_v17, %v1236_v57  ;;  %v611_v20 = vrot.slane %v597_v16, %v1234_v54  ;;  %v1102_v54 = vpack.c.bf16 %v489_v26, %v488_v24 }
 0x887   :  { %v622_v21 = vadd.f32 %v615_v19, %v480_v48  ;;  %v619_v22 = vrot.slane %v611_v20, %v1236_v57  ;;  %1103 = vmatprep.subr.bf16.mxu1 %v1102_v54  ;;  %v943_v57 = vld [vmem:[%s1349_s1 + $0xa6] ss:$0 sm:$0xff]  ;;  %s1132_s1 = scalar_lea.vmem %s917_s22, 32 }
 0x888   :  { %1105 = vmatpush3.bf16.msra.mxu1 %v1102_v54  ;;  %p1133_p0 = scmp.ne.s32.totalorder %s917_s22, %s1132_s1  ;;  %p1138_p2 = scmp.lt.s32.totalorder %s1132_s1, %s1132_s1 }
 0x889   :  { %1043 = vmatprep.mubr.msk.f32.mxu0 %vm273_vm7, %v622_v21  ;;  %v623_v23 = vadd.f32 %v619_v22, %v481_v49 }
 0x88a   :  { %p1139_p3 = por %p1138_p2, %p1137_p1 }
 0x88b   :  { %1044 = vmatmul.mubr.msk.f32.vlgmr.msra.gmra.mrb[4].mxu0 %vm273_vm7, %v623_v23 }
 0x88c   :  { %1061 = vmatprep.mubr.msk.f32.mxu0 %vm1159_vm4, %v1157_v14  ;;  %p1140_p4 = pnand %p1139_p3, %p1133_p0 }
 0x95e   :  { %v1045_v27 = vpop.f32.mrb[4].mxu0 }
 0x95f   :  { %v706_v28 = vadd.f32 %v1045_v27, %v943_v57  ;;  %v700_v29 = vpop.f32.mrb[5].mxu0 }
 0x960   :  { %v701_v30 = vadd.f32 %v943_v57, %v700_v29 }
 0x961   :  { %v710_v31 = vmax.f32 %v706_v28, 0.0 }
 0x962   :  { %v709_v14 = vmax.f32 %v701_v30, 0.0 }
 0x964   :  { %1054 = vmatprep.mubr.msk.f32.mxu1 %vm273_vm7, %v709_v14 }
 0x965   :  { %1055 = vmatmul.mubr.msk.f32.vlgmr.msra.gmra.mrb[6].mxu1 %vm273_vm7, %v710_v31 }
 0xa38   :  { %v1056_v33 = vpop.f32.mrb[6].mxu1 }
 0xa39   :  { %v787_v34 = vpop.f32.mrb[7].mxu1  ;;  %v793_v36 = vadd.f32 %v1056_v33, %v946_v32 }
 0xa3a   :  { %v788_v35 = vadd.f32 %v946_v32, %v787_v34 }
 0xa3b   :  { %v799_v38 = vsel %vm273_vm7, %v793_v36, 0.0 }
 0xa3c   :  { %v796_v37 = vsel %vm273_vm7, %v788_v35, 0.0 }
 0xa3d   :  { %797 = vadd.xlane.f32.xlu1 %v796_v37 }
 0xa41   :  { %800 = vadd.xlane.f32.xlu1 %v799_v38 }
 0xaca   :  { %v798_v39 = vpop.xlane.xlu1 %797 }
 0xacb   :  { %v802_v40 = vmul.f32 0.03125, %v798_v39 }
 0xacd   :  { %v804_v41 = vsub.f32 %v788_v35, %v802_v40 }
 0xace   :  { %v801_v42 = vpop.xlane.xlu1 %800 }
 0xacf   :  { %v803_v43 = vmul.f32 0.03125, %v801_v42  ;;  %v806_v44 = vmul.f32 %v804_v41, %v804_v41 }
 0xad1   :  { %v805_v45 = vsub.f32 %v793_v36, %v803_v43  ;;  %v808_v46 = vsel %vm273_vm7, %v806_v44, 0.0 }
 0xad2   :  { %809 = vadd.xlane.f32.xlu1 %v808_v46 }
 0xad3   :  { %v807_v47 = vmul.f32 %v805_v45, %v805_v45 }
 0xad5   :  { %v811_v48 = vsel %vm273_vm7, %v807_v47, 0.0 }
 0xad6   :  { %812 = vadd.xlane.f32.xlu0 %v811_v48 }
 0xb5f   :  { %v810_v49 = vpop.xlane.xlu1 %809 }
 0xb60   :  { %v814_v50 = vmul.f32 0.03125, %v810_v49 }
 0xb62   :  { %v816_v51 = vadd.f32 1e-05, %v814_v50 }
 0xb63   :  { %v813_v52 = vpop.xlane.xlu0 %812 }
 0xb64   :  { %1128 = vrsqrt.f32 %v816_v51  ;;  %v815_v53 = vmul.f32 0.03125, %v813_v52 }
 0xb66   :  { %v817_v55 = vadd.f32 1e-05, %v815_v53 }
 0xb68   :  { %1130 = vrsqrt.f32 %v817_v55 }
 0xb6e   :  { %v1129_v56 = vpop.eup %1128 }
 0xb6f   :  { %v820_v59 = vmul.f32 %v1129_v56, %v804_v41 }
 0xb71   :  { %v826_v60 = vmul.f32 %v949_v58, %v820_v59 }
 0xb72   :  { %v1131_v61 = vpop.eup %1130 }
 0xb73   :  { %v821_v63 = vmul.f32 %v1131_v61, %v805_v45  ;;  %v832_v1 = vadd.f32 %v950_v62, %v826_v60 }
 0xb75   :  { %v827_v0 = vmul.f32 %v949_v58, %v821_v63  ;;  %v834_v3 = vadd.f32 %v832_v1, %v622_v21 }
 0xb77   :  { %v833_v2 = vadd.f32 %v950_v62, %v827_v0 }
 0xb79   :  { %v835_v4 = vadd.f32 %v833_v2, %v623_v23 }
 0xb7b   :  { %v1107_v5 = vpack.c.bf16 %v835_v4, %v834_v3 }
 0xb7d   :  { %1108 = vmatpush3.bf16.msra.mxu0 %v1107_v5 }
 0xb80   :  { %1062 = vmatmul.mubr.msk.f32.vlgmr.msra.gmra.mrb[6].mxu0 %vm135_vm5, %v836_v6 }
 0xc53   :  { %v905_v7 = vpop.f32.mrb[6].mxu0 }
 0xc54   :  { %909 = vst.msk [vmem:[#allocation2] sm:$0x3] %vm209_vm6, %v905_v7  ;;  %v1063_v8 = vpop.f32.mrb[7].mxu0 }
 0xc55   :  { %1143 = shalt.err (!%p1140_p4)
}
 0xc56   :  { %s1144_s24 = scalar_lea.hbm %s1350_s2, 32 }
 0xc57   :  { %p1145_p5 = scmp.ne.s32.totalorder %s1350_s2, %s1144_s24  ;;  %p1148_p6 = scmp.lt.u32.totalorder %s1144_s24, %s1350_s2 }
 0xc59   :  { %p1150_p7 = pnand %p1148_p6, %p1145_p5 }
 0xc5b   :  { %1153 = shalt.err (!%p1150_p7)
}
 0xc5c   :  { %919 = dma.vmem_to_hbm [thread:$0]  %s917_s22, 32, %s1350_s2, [#allocation3]  }
 0xc5d   :  { %1154 = dma.done.wait [#allocation3], 32  }
 0xc5e   :  { %1155 = vsyncadd [#allocation3], 4294967264 }
 0xc5f   :  { %923 = vsyncpa [#allocation3], 1 }

</bundles_post_ra>
